<compile_context>
chip_gen: v5e
topology: v5e:2x2
jax: 0.10.0
libtpu: 0.0.40
codegen_flags: <defaults>
</compile_context>

<pallas_src>
import math
from functools import partial

import jax
import jax.numpy as jnp
from jax.experimental import pallas as pl
from jax.experimental.pallas import tpu as pltpu


def _lap_mse_partial_kernel(x_ref, tsum_ref, out_ref, *, n_valid):
    # x_ref:    (TB, C, H, W)  block of input images
    # tsum_ref: (TB, H, W)     precomputed channel-sum of the target
    # out_ref:  (1, 1, 1)      per-grid-step partial sum of squared errors
    TB, C, H, W = x_ref.shape

    # Per-channel cast-and-add: never materializes a (TB, C, H, W) f32 temporary.
    xs = x_ref[:, 0].astype(jnp.float32)
    for c in range(1, C):                            # C == 3, unrolled at trace time
        xs = xs + x_ref[:, c].astype(jnp.float32)
    s = tsum_ref[...].astype(jnp.float32) - xs       # (TB, H, W); conv bias cancels

    # Zero images beyond N (ragged tail block when TB does not divide N).
    base = pl.program_id(0) * TB
    bidx = jax.lax.broadcasted_iota(jnp.int32, (TB, H, W), 0)
    s = jnp.where(base + bidx < n_valid, s, 0.0)

    # Fused 5-point Laplacian with the padding=1 zero halo:
    # neighbours via XLU rolls (positive shifts only), boundaries masked to zero.
    ridx = jax.lax.broadcasted_iota(jnp.int32, (TB, H, W), 1)
    cidx = jax.lax.broadcasted_iota(jnp.int32, (TB, H, W), 2)
    up    = jnp.where(ridx == 0,     0.0, pltpu.roll(s, 1,     axis=1))  # s[i-1, j]
    down  = jnp.where(ridx == H - 1, 0.0, pltpu.roll(s, H - 1, axis=1))  # s[i+1, j]
    left  = jnp.where(cidx == 0,     0.0, pltpu.roll(s, 1,     axis=2))  # s[i, j-1]
    right = jnp.where(cidx == W - 1, 0.0, pltpu.roll(s, W - 1, axis=2))  # s[i, j+1]
    d = 4.0 * s - up - down - left - right

    out_ref[...] = jnp.broadcast_to(jnp.sum(d * d), (1, 1, 1))


def laplacian_loss_init(target, dtype=jnp.float32):
    """Mirrors LaplacianLoss.__init__: precompute what forward() needs from the
    constant target.  Only the channel sum is required (stencil deferred, bias
    cancels).  Pass dtype=jnp.bfloat16 to halve HBM traffic (kernel casts on load)."""
    return jnp.sum(target.astype(jnp.float32), axis=1).astype(dtype)   # (N, H, W)


def _vmem_capacity_bytes():
    try:
        return int(pltpu.get_tpu_info().vmem_capacity_bytes)
    except Exception:
        return 64 * 1024 * 1024          # conservative fallback (v7x per-TC VMEM)


def laplacian_loss_forward(x, target_channel_sum):
    """Mirrors LaplacianLoss.forward: returns (x, loss)."""
    N, C, H, W = x.shape
    assert C == 3, "Conv2d(3, 1, ...) expects 3 input channels"
    assert target_channel_sum.shape == (N, H, W)

    vmem = _vmem_capacity_bytes()
    budget = max(2 << 20, vmem // 8)            # ~16 MiB/step (v5e/v6e), ~8 MiB (v7x)
    vmem_limit = min((vmem * 3) // 4, 112 << 20)  # ~96 MiB (v5e/v6e), ~48 MiB (v7x)

    per_image = (C * x.dtype.itemsize + target_channel_sum.dtype.itemsize) * H * W
    tb = max(1, min(N, budget // per_image))
    g = pl.cdiv(N, tb)
    if N >= 2:
        # Keep at least 2 (preferably an even number of) grid steps so both v7x
        # TensorCores stream; harmless on single-TC chips.
        g = max(g, 2)
        if g % 2:
            g = min(g + 1, N)
        tb = pl.cdiv(N, g)
        g = pl.cdiv(N, tb)
    # TODO(synk): add H-tiling with a 1-row halo for images whose single-image block
    # exceeds the per-step budget (e.g. 1080p on v7x); unnecessary at these shapes.

    partials = pl.pallas_call(
        partial(_lap_mse_partial_kernel, n_valid=N),
        out_shape=jax.ShapeDtypeStruct((g, 1, 1), jnp.float32),
        grid=(g,),
        in_specs=[
            pl.BlockSpec((tb, C, H, W), lambda i: (i, 0, 0, 0)),
            pl.BlockSpec((tb, H, W), lambda i: (i, 0, 0)),
        ],
        out_specs=pl.BlockSpec((1, 1, 1), lambda i: (i, 0, 0)),
        compiler_params=pltpu.CompilerParams(
            dimension_semantics=("parallel",),    # disjoint per-step outputs
            vmem_limit_bytes=int(vmem_limit),
        ),
    )(x, target_channel_sum)

    loss = jnp.sum(partials) / jnp.float32(N * H * W)
    return x, loss


def _reference_loss(x, target, bias):
    """Pure-JAX reference: real conv with the laplacian weights (+ bias), then MSE."""
    lap = jnp.array([[0., -1., 0.], [-1., 4., -1.], [0., -1., 0.]], jnp.float32)
    w = jnp.broadcast_to(lap, (1, 3, 3, 3))                   # (O, I, kH, kW)

    def conv(v):
        return jax.lax.conv_general_dilated(
            v.astype(jnp.float32), w, window_strides=(1, 1),
            padding=((1, 1), (1, 1)),
            dimension_numbers=("NCHW", "OIHW", "NCHW")) + bias[0]

    d = conv(target) - conv(x)
    return jnp.mean(d * d)


if __name__ == "__main__":
    key = jax.random.PRNGKey(0)
    kx, kt, kb = jax.random.split(key, 3)

    N, C, H, W = 2, 3, 16, 16
    x = jax.random.normal(kx, (N, C, H, W), jnp.float32)
    target = jax.random.normal(kt, (N, C, H, W), jnp.float32)

    # Conv2d default bias init: U(-1/sqrt(fan_in), 1/sqrt(fan_in)), fan_in = 3*3*3.
    # (The bias cancels in the loss; kept only so the reference matches the module.)
    bound = 1.0 / math.sqrt(3 * 3 * 3)
    bias = jax.random.uniform(kb, (1,), jnp.float32, minval=-bound, maxval=bound)

    t_sum = laplacian_loss_init(target)          # __init__-time precompute
    fwd = jax.jit(laplacian_loss_forward)
    x_out, loss = fwd(x, t_sum)
    jax.block_until_ready((x_out, loss))

    ref = _reference_loss(x, target, bias)
    assert jnp.allclose(loss, ref, rtol=1e-5, atol=1e-5), (loss, ref)
    assert jnp.array_equal(x_out, x)             # forward() returns its input unchanged

    print("KERNEL_OK")
</pallas_src>

<mosaic_0001>
module attributes {stable_mosaic.version = 11 : i64} {
  func.func @_lap_mse_partial_kernel(%arg0: i32, %arg1: memref<1x3x16x16xf32, #tpu.memory_space<vmem>>, %arg2: memref<1x16x16xf32, #tpu.memory_space<vmem>>, %arg3: memref<1x1x1xf32, #tpu.memory_space<vmem>>) attributes {dimension_semantics = [#tpu.dimension_semantics<parallel>], iteration_bounds = array<i64: 2>, scalar_prefetch = 0 : i64, scratch_operands = 0 : i64, tpu.core_type = #tpu.core_type<tc>, window_params = [{transform_indices = @transform_0, window_bounds = array<i64: 1, 3, 16, 16>}, {transform_indices = @transform_1, window_bounds = array<i64: 1, 16, 16>}, {transform_indices = @transform_2, window_bounds = array<i64: 1, 1, 1>}]} {
    %c0 = arith.constant 0 : index
    %c0_0 = arith.constant 0 : index
    %c0_1 = arith.constant 0 : index
    %c0_2 = arith.constant 0 : index
    %0 = vector.load %arg1[%c0, %c0_0, %c0_1, %c0_2] : memref<1x3x16x16xf32, #tpu.memory_space<vmem>>, vector<1x1x16x16xf32>
    %1 = vector.shape_cast %0 : vector<1x1x16x16xf32> to vector<1x16x16xf32>
    %c0_3 = arith.constant 0 : index
    %c1 = arith.constant 1 : index
    %c0_4 = arith.constant 0 : index
    %c0_5 = arith.constant 0 : index
    %2 = vector.load %arg1[%c0_3, %c1, %c0_4, %c0_5] : memref<1x3x16x16xf32, #tpu.memory_space<vmem>>, vector<1x1x16x16xf32>
    %3 = vector.shape_cast %2 : vector<1x1x16x16xf32> to vector<1x16x16xf32>
    %4 = arith.addf %1, %3 : vector<1x16x16xf32>
    %c0_6 = arith.constant 0 : index
    %c2 = arith.constant 2 : index
    %c0_7 = arith.constant 0 : index
    %c0_8 = arith.constant 0 : index
    %5 = vector.load %arg1[%c0_6, %c2, %c0_7, %c0_8] : memref<1x3x16x16xf32, #tpu.memory_space<vmem>>, vector<1x1x16x16xf32>
    %6 = vector.shape_cast %5 : vector<1x1x16x16xf32> to vector<1x16x16xf32>
    %7 = arith.addf %4, %6 : vector<1x16x16xf32>
    %c0_9 = arith.constant 0 : index
    %c0_10 = arith.constant 0 : index
    %c0_11 = arith.constant 0 : index
    %8 = vector.load %arg2[%c0_9, %c0_10, %c0_11] : memref<1x16x16xf32, #tpu.memory_space<vmem>>, vector<1x16x16xf32>
    %9 = arith.subf %8, %7 : vector<1x16x16xf32>
    %c1_i32 = arith.constant 1 : i32
    %10 = arith.muli %arg0, %c1_i32 : i32
    %11 = tpu.iota {dimensions = array<i32: 0>} : vector<1x16x16xi32>
    %12 = vector.broadcast %10 : i32 to vector<1x16x16xi32>
    %13 = arith.addi %12, %11 : vector<1x16x16xi32>
    %c2_i32 = arith.constant 2 : i32
    %14 = vector.broadcast %c2_i32 : i32 to vector<1x16x16xi32>
    %15 = arith.cmpi slt, %13, %14 : vector<1x16x16xi32>
    %cst = arith.constant 0.000000e+00 : f32
    %16 = vector.broadcast %cst : f32 to vector<1x16x16xf32>
    %17 = arith.select %15, %9, %16 : vector<1x16x16xi1>, vector<1x16x16xf32>
    %18 = tpu.iota {dimensions = array<i32: 1>} : vector<1x16x16xi32>
    %19 = tpu.iota {dimensions = array<i32: 2>} : vector<1x16x16xi32>
    %c0_i32 = arith.constant 0 : i32
    %20 = vector.broadcast %c0_i32 : i32 to vector<1x16x16xi32>
    %21 = arith.cmpi eq, %18, %20 : vector<1x16x16xi32>
    %c1_i32_12 = arith.constant 1 : i32
    %22 = tpu.dynamic_rotate %17 by %c1_i32_12 dim 1 : vector<1x16x16xf32>, i32 -> vector<1x16x16xf32>
    %cst_13 = arith.constant 0.000000e+00 : f32
    %23 = vector.broadcast %cst_13 : f32 to vector<1x16x16xf32>
    %24 = arith.select %21, %23, %22 : vector<1x16x16xi1>, vector<1x16x16xf32>
    %c15_i32 = arith.constant 15 : i32
    %25 = vector.broadcast %c15_i32 : i32 to vector<1x16x16xi32>
    %26 = arith.cmpi eq, %18, %25 : vector<1x16x16xi32>
    %c15_i32_14 = arith.constant 15 : i32
    %27 = tpu.dynamic_rotate %17 by %c15_i32_14 dim 1 : vector<1x16x16xf32>, i32 -> vector<1x16x16xf32>
    %cst_15 = arith.constant 0.000000e+00 : f32
    %28 = vector.broadcast %cst_15 : f32 to vector<1x16x16xf32>
    %29 = arith.select %26, %28, %27 : vector<1x16x16xi1>, vector<1x16x16xf32>
    %c0_i32_16 = arith.constant 0 : i32
    %30 = vector.broadcast %c0_i32_16 : i32 to vector<1x16x16xi32>
    %31 = arith.cmpi eq, %19, %30 : vector<1x16x16xi32>
    %c1_i32_17 = arith.constant 1 : i32
    %32 = tpu.dynamic_rotate %17 by %c1_i32_17 dim 2 : vector<1x16x16xf32>, i32 -> vector<1x16x16xf32>
    %cst_18 = arith.constant 0.000000e+00 : f32
    %33 = vector.broadcast %cst_18 : f32 to vector<1x16x16xf32>
    %34 = arith.select %31, %33, %32 : vector<1x16x16xi1>, vector<1x16x16xf32>
    %c15_i32_19 = arith.constant 15 : i32
    %35 = vector.broadcast %c15_i32_19 : i32 to vector<1x16x16xi32>
    %36 = arith.cmpi eq, %19, %35 : vector<1x16x16xi32>
    %c15_i32_20 = arith.constant 15 : i32
    %37 = tpu.dynamic_rotate %17 by %c15_i32_20 dim 2 : vector<1x16x16xf32>, i32 -> vector<1x16x16xf32>
    %cst_21 = arith.constant 0.000000e+00 : f32
    %38 = vector.broadcast %cst_21 : f32 to vector<1x16x16xf32>
    %39 = arith.select %36, %38, %37 : vector<1x16x16xi1>, vector<1x16x16xf32>
    %cst_22 = arith.constant 4.000000e+00 : f32
    %40 = vector.broadcast %cst_22 : f32 to vector<1x16x16xf32>
    %41 = arith.mulf %40, %17 : vector<1x16x16xf32>
    %42 = arith.subf %41, %24 : vector<1x16x16xf32>
    %43 = arith.subf %42, %29 : vector<1x16x16xf32>
    %44 = arith.subf %43, %34 : vector<1x16x16xf32>
    %45 = arith.subf %44, %39 : vector<1x16x16xf32>
    %46 = arith.mulf %45, %45 : vector<1x16x16xf32>
    %47 = vector.shape_cast %46 : vector<1x16x16xf32> to vector<1x1x16x16xf32>
    %cst_23 = arith.constant dense<0.000000e+00> : vector<1xf32>
    %48 = vector.multi_reduction <add>, %47, %cst_23 [1, 2, 3] : vector<1x1x16x16xf32> to vector<1xf32>
    %49 = vector.shape_cast %48 : vector<1xf32> to vector<1x1x1x1xf32>
    %50 = vector.extract %49[0, 0, 0, 0] : f32 from vector<1x1x1x1xf32>
    %51 = vector.broadcast %50 : f32 to vector<1x1x1xf32>
    %c0_24 = arith.constant 0 : index
    %c0_25 = arith.constant 0 : index
    %c0_26 = arith.constant 0 : index
    %52 = vector.load %arg3[%c0_24, %c0_25, %c0_26] : memref<1x1x1xf32, #tpu.memory_space<vmem>>, vector<1x1x1xf32>
    tpu.vector_store %arg3[%c0_24, %c0_25, %c0_26], %51 {strides = array<i32>} : memref<1x1x1xf32, #tpu.memory_space<vmem>>, vector<1x1x1xf32>,
    return
  }
  func.func @transform_0(%arg0: i32) -> (i32, i32, i32, i32) {
    %c0_i32 = arith.constant 0 : i32
    %c0_i32_0 = arith.constant 0 : i32
    %c0_i32_1 = arith.constant 0 : i32
    %c0_i32_2 = arith.constant 0 : i32
    return %arg0, %c0_i32, %c0_i32_0, %c0_i32_1 : i32, i32, i32, i32
  }
  func.func @transform_1(%arg0: i32) -> (i32, i32, i32) {
    %c0_i32 = arith.constant 0 : i32
    %c0_i32_0 = arith.constant 0 : i32
    %c0_i32_1 = arith.constant 0 : i32
    return %arg0, %c0_i32, %c0_i32_0 : i32, i32, i32
  }
  func.func @transform_2(%arg0: i32) -> (i32, i32, i32) {
    %c0_i32 = arith.constant 0 : i32
    %c0_i32_0 = arith.constant 0 : i32
    %c0_i32_1 = arith.constant 0 : i32
    return %arg0, %c0_i32, %c0_i32_0 : i32, i32, i32
  }
}

</mosaic_0001>

<bundles_post_ra>
// kernel: laplacian_loss_forward.1
= control target key start
LH: loop header
LB: loop body
LE: loop exit
PB: predicated region body
PF: predicated region fallthrough
CT: control target
= control target key end

     0   :  { %7 = vsyncpa [#allocation3], 0  ;;  %s707_s0 = inlined_call_operand.hbm [shape: f32[2,3,16,16], index: 0, kind: input, shape index: {}]   ;;  %s708_s1 = inlined_call_operand.hbm [shape: f32[2,16,16], index: 1, kind: input, shape index: {}]   ;;  %s709_s2 = inlined_call_operand.vmem [shape: f32[2,1,1], index: 2, kind: output, shape index: {}]  }
   0x1   :  { %9 = vsyncpa [#allocation3 + $0x1], 0 }
   0x2   :  { %10 = vsyncpa [#allocation5], 0 }
   0x3   :  { %12 = vsyncpa [#allocation5 + $0x1], 0  ;;  %s580_s9 = smov 0   ;;  %s582_s10 = smov 0  }
   0x4   :  { %s584_s11 = smov 0   ;;  %s586_s12 = smov 0  }
   0x5 LB: > { %s599_s13 = sadd.s32 4294967295, %s558_s12   ;;  %s602_s14 = sadd.s32 1, %s558_s12   ;;  %s558_s12 = sphi %s586_s12, %s716_s12   ;;  %s554_s11 = sphi %s584_s11, %s715_s11   ;;  %s550_s10 = sphi %s582_s10, %s714_s10   ;;  %s546_s9 = sphi %s580_s9, %s713_s9  }
   0x6   : > { %s22_s15 = ssub.s32 %s558_s12, %s602_s14  ;;  %s25_s16 = sadd.s32 1, %s554_s11 }
   0x7   : > { %p23_p0 = scmp.eq.s32.totalorder %s22_s15, 0  ;;  %p32_p1 = scmp.ne.s32.totalorder %s554_s11, %s550_s10 }
   0x8   : > { %p33_p2 = scmp.eq.s32.totalorder %s558_s12, 0  ;;  %p38_p3 = scmp.ne.s32.totalorder %s550_s10, %s546_s9 }
   0x9   : > { %s612_s17 = scalar_select %p23_p0, %s554_s11, %s25_s16  }
   0xa   : > { %p34_p4 = por %p33_p2, %p32_p1  ;;  %p39_p5 = scmp.eq.s32.totalorder %s599_s13, 0 }
   0xb   : > { %p422_p6 = scmp.lt.s32.totalorder %s558_s12, 2  ;;  %s621_s19 = sand.u32 1, %s554_s11  }
   0xc   : > { %p616_p7 = por %p39_p5, %p38_p3  ;;  %s406_s20 = smul.u32 48, %s621_s19 }
   0xd   : > { %s407_s21 = smul.u32 48, %s558_s12  ;;  %p625_p8 = pnand %p422_p6, %p34_p4 }
   0xe   : > { %s118_s26 = scalar_lea.vmem [#allocation2], %s406_s20  ;;  %p397_p9 = scmp.ge.s32.totalorder %s558_s12, 1 }
   0xf   : > { %s123_s25 = scalar_lea.hbm %s707_s0, %s407_s21  ;;  %s126_s27 = sshll.u32 %s118_s26, 4  ;;  %s127_s27 = int_to_ptr.vmem [resolvable:$true] %s126_s27 }
  0x10   : > { %s124_s28 = sshll.u32 %s123_s25, 4  ;;  %s115_s29 = scalar_lea.sflag [#allocation3], %s621_s19  ;;  %s125_s28 = int_to_ptr.hbm [resolvable:$true] %s124_s28 }
  0x11   : > { %s460_s30 = sshra.s32 %s125_s28, 4  ;;  %p464_p11 = pneg %p625_p8  ;;  %s461_s30 = int_to_ptr.hbm [resolvable:$true] %s460_s30 }
  0x12   : > { %s462_s3 = scalar_lea.hbm %s461_s30, 48  ;;  %s467_s6 = scalar_lea.hbm %s707_s0, 96 }
  0x13   : > { %p463_p10 = scmp.ne.s32.totalorder %s461_s30, %s462_s3  ;;  %p468_p0 = scmp.lt.s32.totalorder %s461_s30, %s707_s0 }
  0x14   : > { %p469_p1 = scmp.lt.s32.totalorder %s467_s6, %s462_s3 }
  0x15   : > { %p465_p12 = pnand %p464_p11, %p463_p10 }
  0x16   : > { %p470_p2 = por %p469_p1, %p468_p0 }
  0x17   : > { %p466_p13 = pneg %p465_p12 }
  0x19   : > { %p471_p3 = pnand %p470_p2, %p466_p13 }
  0x1b   : > { %474 = shalt.err (!%p471_p3)
}
  0x1c   : > { %s560_s9 = smov 128   ;;  %s561_s15 = smov 8  }
  0x1d   : > { %418 = dma.hbm_to_vmem [thread:$0]  (!%p625_p8), %s125_s28, 768, %s127_s27, %s115_s29, %s560_s9, %s560_s9, %s561_s15  }
  0x1e   : > { %p156_p4 = scmp.lt.s32.totalorder %s558_s12, 3  ;;  %s394_s16 = sshll.u32 %s621_s19, 4 }
  0x1f   : > { %s405_s20 = sshll.u32 %s558_s12, 4  ;;  %s140_s26 = scalar_lea.vmem [#allocation4], %s394_s16 }
  0x20   : > { %p655_p5 = pnand %p397_p9, %p156_p4  ;;  %s145_s25 = scalar_lea.hbm %s708_s1, %s405_s20 }
  0x21   : > { %s148_s30 = sshll.u32 %s140_s26, 4  ;;  %s146_s3 = sshll.u32 %s145_s25, 4  ;;  %s149_s30 = int_to_ptr.vmem [resolvable:$true] %s148_s30  ;;  %s147_s3 = int_to_ptr.hbm [resolvable:$true] %s146_s3 }
  0x22   : > { %s137_s4 = scalar_lea.sflag [#allocation5], %s621_s19  ;;  %s490_s27 = sshra.s32 %s147_s3, 4  ;;  %s491_s27 = int_to_ptr.hbm [resolvable:$true] %s490_s27 }
  0x23   : > { %s492_s28 = scalar_lea.hbm %s491_s27, 16  ;;  %s497_s5 = scalar_lea.hbm %s708_s1, 32 }
  0x24   : > { %p493_p6 = scmp.ne.s32.totalorder %s491_s27, %s492_s28  ;;  %p498_p12 = scmp.lt.s32.totalorder %s491_s27, %s708_s1 }
  0x25   : > { %p499_p13 = scmp.lt.s32.totalorder %s497_s5, %s492_s28 }
  0x26   : > { %p495_p9 = pnand %p493_p6, %p464_p11 }
  0x27   : > { %p500_p0 = por %p499_p13, %p498_p12 }
  0x28   : > { %p496_p10 = pneg %p495_p9 }
  0x2a   : > { %p501_p1 = pnand %p500_p0, %p496_p10 }
  0x2c   : > { %504 = shalt.err (!%p501_p1)
}
  0x2d   : > { %421 = dma.hbm_to_vmem [thread:$0]  (!%p625_p8), %s147_s3, 256, %s149_s30, %s137_s4, %s560_s9, %s560_s9, %s561_s15  }
  0x2e   : > { %160 = sbr.rel (%p655_p5) target bundleno = 606 (0x25e), region = 28  ;;  %s162_s19 = sand.u32 (!%p655_p5), 1, %s550_s10  }
  0x2f   : > { %s408_s8 = smul.u32 (!%p655_p5), 48, %s162_s19  ;;  %s163_s16 = scalar_lea.sflag (!%p655_p5), [#allocation3], %s162_s19 }
  0x31   : > { %s166_s20 = scalar_lea.vmem (!%p655_p5), [#allocation2], %s408_s8 }
  0x33   : > { %537 = dma.done.wait (%p616_p7), %s163_s16, 768  }
  0x34   : > { %539 = vsyncadd (%p616_p7), %s163_s16, 4294966528  ;;  %s398_s22 = sshll.u32 %s162_s19, 4  ;;  %s173_s23 = scalar_lea.sflag [#allocation5], %s162_s19 }
  0x35   : > { %s176_s24 = scalar_lea.vmem [#allocation4], %s398_s22 }
  0x36   : > { %541 = dma.done.wait (%p616_p7), %s173_s23, 256  }
  0x37   : > { %543 = vsyncadd (%p616_p7), %s173_s23, 4294967040  ;;  %v204_v0 = vld [vmem:[%s166_s20] sm:$0xff]  ;;  %v399_v1 = vld [vmem:[%s166_s20 + $0x10] sm:$0xff]  ;;  %v220_v4 = vstv %s599_s13  ;;  %s562_s9 = smov 16   ;;  %vm248_vm1 = vcmask 1047680   ;;  %s563_s18 = smov 127   ;;  %v224_v25 = vlaneseq }
  0x38   : > { %v401_v2 = vld [vmem:[%s166_s20 + $0x20] sm:$0xff]  ;;  %v209_v3 = vadd.f32 %v399_v1, %v204_v0  ;;  %v205_v5 = vld [vmem:[%s166_s20 + $0x8] sm:$0xff]  ;;  %v400_v6 = vld [vmem:[%s166_s20 + $0x18] sm:$0xff]  ;;  %vm221_vm0 = vcmp.lt.s32.totalorder %v220_v4, 2  ;;  %s564_s15 = smov 113   ;;  %vm292_vm8 = vcmask 130048  }
  0x39   : > { %v216_v7 = vld [vmem:[%s176_s24] sm:$0xff]  ;;  %v210_v8 = vadd.f32 %v400_v6, %v205_v5  ;;  %v402_v9 = vld [vmem:[%s166_s20 + $0x28] sm:$0xff]  ;;  %v225_v26 = vshrl.u32 %v224_v25, 7  ;;  %v228_v35 = vand.u32 127, %v224_v25  ;;  %p201_p7 = scmp.lt.s32.totalorder %s599_s13, 1  ;;  %vm306_vm9 = vcmask 0  }
  0x3a   : > { %v214_v10 = vadd.f32 %v401_v2, %v209_v3  ;;  %v217_v13 = vld [vmem:[%s176_s24 + $0x8] sm:$0xff] }
  0x3b   : > { %v215_v12 = vadd.f32 %v402_v9, %v210_v8  ;;  %vm233_vm2 = vcmp.lt.s32.totalorder %v225_v26, 1  ;;  %vm229_vm3 = vcmp.eq.s32.totalorder %v225_v26, 0  ;;  %vm242_vm4 = vcmp.lt.s32.totalorder %v225_v26, 7  ;;  %s718_s13 = smov (!%p201_p7, %s599_s13), 1 }
  0x3c   : > { %v218_v11 = vsub.f32 %v216_v7, %v214_v10  ;;  %v226_v36 = vadd.s32 8, %v225_v26  ;;  %vm247_vm5 = vcmp.eq.s32.totalorder %v228_v35, 0  ;;  %vm271_vm7 = vcmp.eq.s32.totalorder %v228_v35, 15  ;;  %s203_s26 = scalar_lea.vmem %s709_s2, %s718_s13 }
  0x3d   : > { %v219_v15 = vsub.f32 %v217_v13, %v215_v12 }
  0x3e   : > { %v222_v14 = vsel %vm221_vm0, %v218_v11, 0.0  ;;  %vm239_vm6 = vcmp.eq.s32.totalorder %v226_v36, 15 }
  0x3f   : > { %249 = vrot.lane.b32.xlu0 %v222_v14, %s562_s9  ;;  %v223_v16 = vsel %vm221_vm0, %v219_v15, 0.0  ;;  %v231_v28 = vrot.slane %v222_v14, 7  ;;  %v280_v31 = vmul.f32 4.0, %v222_v14  ;;  %v240_v34 = vrot.slane %v222_v14, 1 }
  0x40   : > { %v232_v27 = vrot.slane %v223_v16, 7  ;;  %v241_v32 = vrot.slane %v223_v16, 1  ;;  %v281_v38 = vmul.f32 4.0, %v223_v16 }
  0x42   : > { %v235_v29 = vsel %vm233_vm2, %v232_v27, %v231_v28  ;;  %v243_v39 = vsel %vm242_vm4, %v240_v34, %v241_v32  ;;  %v234_v40 = vsel %vm233_vm2, %v231_v28, %v232_v27  ;;  %v244_v41 = vsel %vm242_vm4, %v241_v32, %v240_v34 }
  0x43   : > { %v236_v33 = vsel %vm229_vm3, 0.0, %v235_v29  ;;  %v283_v43 = vsub.f32 %v281_v38, %v234_v40  ;;  %v246_v46 = vsel %vm239_vm6, 0.0, %v244_v41 }
  0x44   : > { %v282_v37 = vsub.f32 %v280_v31, %v236_v33 }
  0x45   : > { %v285_v50 = vsub.f32 %v283_v43, %v246_v46 }
  0x46   : > { %v284_v42 = vsub.f32 %v282_v37, %v243_v39 }
  0x47   : > { %252 = vrot.lane.b32.xlu0 %v223_v16, %s562_s9 }
  0xb1   : > { %v250_v17 = vpop.permute.xlu0 %249 }
  0xb2   : > { %v251_v18 = vsel %vm248_vm1, %v250_v17, %v222_v14 }
  0xb3   : > { %255 = vrot.lane.b32.xlu1 %v251_v18, %s562_s9 }
  0xb9   : > { %v253_v19 = vpop.permute.xlu0 %252 }
  0xba   : > { %v254_v20 = vsel %vm248_vm1, %v253_v19, %v223_v16 }
  0xbb   : > { %257 = vrot.lane.b32.xlu1 %v254_v20, %s562_s9 }
 0x125   : > { %v256_v21 = vpop.permute.xlu1 %255 }
 0x126   : > { %v259_v22 = vsel %vm248_vm1, %v256_v21, %v222_v14 }
 0x127   : > { %272 = vrot.lane.b32.xlu0 %v259_v22, %s563_s18  ;;  %263 = vrot.lane.b32.xlu2 %v259_v22, %s564_s15 }
 0x12d   : > { %v258_v23 = vpop.permute.xlu1 %257 }
 0x12e   : > { %v260_v24 = vsel %vm248_vm1, %v258_v23, %v223_v16 }
 0x12f   : > { %274 = vrot.lane.b32.xlu1 %v260_v24, %s563_s18  ;;  %265 = vrot.lane.b32.xlu2 %v260_v24, %s564_s15 }
 0x181   : > { %v264_v30 = vpop.permute.xlu2 %263 }
 0x182   : > { %v269_v45 = vsel %vm247_vm5, 0.0, %v264_v30 }
 0x183   : > { %v286_v49 = vsub.f32 %v284_v42, %v269_v45 }
 0x189   : > { %v266_v47 = vpop.permute.xlu2 %265 }
 0x18a   : > { %v270_v51 = vsel %vm247_vm5, 0.0, %v266_v47 }
 0x18b   : > { %v287_v53 = vsub.f32 %v285_v50, %v270_v51 }
 0x199   : > { %v273_v44 = vpop.permute.xlu0 %272 }
 0x19a   : > { %v278_v48 = vsel %vm271_vm7, 0.0, %v273_v44 }
 0x19b   : > { %v288_v52 = vsub.f32 %v286_v49, %v278_v48 }
 0x19d   : > { %v290_v56 = vmul.f32 %v288_v52, %v288_v52 }
 0x19f   : > { %v293_v59 = vsel %vm292_vm8, %v290_v56, 0.0 }
 0x1a1   : > { %v275_v54 = vpop.permute.xlu1 %274 }
 0x1a2   : > { %v279_v55 = vsel %vm271_vm7, 0.0, %v275_v54 }
 0x1a3   : > { %v289_v57 = vsub.f32 %v287_v53, %v279_v55 }
 0x1a5   : > { %v291_v58 = vmul.f32 %v289_v57, %v289_v57 }
 0x1a7   : > { %v294_v60 = vsel %vm292_vm8, %v291_v58, 0.0 }
 0x1a8   : > { %v295_v61 = vadd.f32 %v294_v60, %v293_v59 }
 0x1aa   : > { %296 = vadd.xlane.f32.xlu2 %v295_v61 }
 0x21d   : > { %v297_v62 = vpop.xlane.xlu2 %296 }
 0x21e   : > { %v298_v63 = vrot.slane %v297_v62, 4 }
 0x220   : > { %v299_v0 = vadd.f32 %v298_v63, %v297_v62 }
 0x222   : > { %v300_v1 = vrot.slane %v299_v0, 2 }
 0x224   : > { %v301_v2 = vadd.f32 %v300_v1, %v299_v0 }
 0x226   : > { %v302_v3 = vrot.slane %v301_v2, 1 }
 0x228   : > { %v303_v4 = vadd.f32 %v302_v3, %v301_v2 }
 0x22a   : > { %409 = vpush %v303_v4 }
 0x25b   : > { %s410_s30 = spop %409 }
 0x25c   : > { %v305_v5 = vstv %s410_s30 }
 0x25d   : > { %307 = vst.msk [vmem:[%s203_s26] sm:$0x1] %vm306_vm9, %v305_v5 }
 0x25e PF: > { %p15_p8 = scmp.ge.s32.totalorder %s602_s14, 4   ;;  %s713_s9 = smov %s550_s10 }
 0x25f   : > { %s714_s10 = smov %s554_s11  ;;  %s715_s11 = smov %s612_s17 }
 0x260   : > { %s716_s12 = smov %s602_s14  ;;  %17 = sbr.rel (!%p15_p8) target bundleno = 5 (0x5), region = 83 }
 0x265   :  { %325 = vsyncpa [#allocation3], 1 }
 0x266   :  { %327 = vsyncpa [#allocation3 + $0x1], 1 }
 0x267   :  { %328 = vsyncpa [#allocation5], 1 }
 0x268   :  { %330 = vsyncpa [#allocation5 + $0x1], 1 }

</bundles_post_ra>
